<compile_context>
chip_gen: v5e
topology: v5e:2x2
jax: 0.10.0
libtpu: 0.0.40
codegen_flags: <defaults>
</compile_context>

<pallas_src>
import functools

import jax
import jax.numpy as jnp
from jax.experimental import pallas as pl
from jax.experimental.pallas import tpu as pltpu


def linear_beta_schedule(timesteps, start=0.0001, end=0.02):
    return jnp.linspace(start, end, timesteps, dtype=jnp.float32)


def _pick_row_tile(n_rows):
    """Sublane-axis tile for the (B, C, rows, 128) layout.

    Multiple of 8 (full (8,128) packing), as large as 512 rows (C=4 f32 ->
    ~1 MiB per x-block) so the ~0.35us per-grid-step overhead is amortized,
    while keeping wrapper-side row padding <= ~12.5%. Double-buffered
    x + noise + out at 512 rows is ~6 MiB: inside the scoped-VMEM defaults of
    v5e (16 MiB), v6e (32 MiB) and v7x (32 MiB of 64 MiB physical).
    """
    if n_rows <= 8:
        return n_rows  # equals the full dim -> allowed by the (8,128) rule
    for cand in (512, 256, 128, 64, 32, 16, 8):
        if cand <= n_rows and ((-n_rows) % cand) * 8 <= n_rows:
            return cand
    return 8


def _generator_kernel(m_ref, b_ref, c3_ref, x_ref, *rest, C, with_noise):
    """One (1, C, R, 128) block of the fused denoiser + DDPM posterior step.

    The DDPM scalars are folded host-side into the channel mix:
        M[ci, co] = c1*I - c2*W      b'[co] = -c2*(b[co] + temb[co])
    so the kernel is C*C full-slab VPU FMAs per block:
        out[co] = sum_ci M[ci, co] * x[ci] + b'[co] (+ c3 * noise[co])

    m_ref  : SMEM (C*C,) f32  (flattened ci-major; 1D avoids SMEM 2D padding)
    b_ref  : SMEM (C,)   f32
    c3_ref : SMEM (1,)   f32  posterior std (read only when with_noise)
    x_ref  : VMEM (1, C, R, 128) f32
    rest   : (noise_ref, o_ref) if with_noise else (o_ref,)
    """
    if with_noise:
        noise_ref, o_ref = rest
    else:
        (o_ref,) = rest

    xs = [x_ref[0, ci] for ci in range(C)]  # C fully-packed (R, 128) slabs
    for co in range(C):
        acc = xs[0] * m_ref[co]
        for ci in range(1, C):
            acc = acc + xs[ci] * m_ref[ci * C + co]
        acc = acc + b_ref[co]
        if with_noise:
            acc = acc + c3_ref[0] * noise_ref[0, co]
        o_ref[0, co] = acc  # direct per-channel store: no sublane concat


class Generator:
    """JAX/Pallas port of the PyTorch reverse-diffusion `Generator` module."""

    def __init__(self, t_max=300, channels=4, seed=0):
        self.t_max = t_max
        self.channels = channels
        self.betas = linear_beta_schedule(timesteps=t_max)
        alphas = 1.0 - self.betas
        alphas_cumprod = jnp.cumprod(alphas)
        alphas_cumprod_prev = jnp.concatenate(
            [jnp.ones((1,), jnp.float32), alphas_cumprod[:-1]]
        )
        self.sqrt_recip_alphas = jnp.sqrt(1.0 / alphas)
        self.sqrt_alphas_cumprod = jnp.sqrt(alphas_cumprod)
        self.sqrt_one_minus_alphas_cumprod = jnp.sqrt(1.0 - alphas_cumprod)
        self.posterior_variance = (
            self.betas * (1.0 - alphas_cumprod_prev) / (1.0 - alphas_cumprod)
        )

        # TODO(synk): the real `self.model(x, t)` is an external UNet passed into
        # the PyTorch module; a deterministic 1x1-conv + time-bias stands in.
        kw, kb, kt = jax.random.split(jax.random.PRNGKey(seed), 3)
        self.w = jax.random.normal(kw, (channels, channels), jnp.float32) * (
            1.0 / (channels ** 0.5)
        )
        self.b = jax.random.normal(kb, (channels,), jnp.float32) * 0.01
        self.time_w = jax.random.normal(kt, (channels,), jnp.float32) * 0.01

    def __call__(self, x, t, noise_key):
        # `t` is a static Python int, matching the PyTorch forward where the
        # `if t == 0` branch is resolved on the host.
        t = int(t)
        B, C, H, W = x.shape
        P = H * W
        n_rows = pl.cdiv(P, 128)
        R_TILE = _pick_row_tile(n_rows)
        rows_pad = pl.cdiv(n_rows, R_TILE) * R_TILE
        P_pad = rows_pad * 128

        # --- fold all DDPM scalars into the channel-mix parameters (host) ---
        c1 = self.sqrt_recip_alphas[t]
        c2 = c1 * self.betas[t] / self.sqrt_one_minus_alphas_cumprod[t]
        temb = jnp.sin(jnp.float32(t) * 0.1) * self.time_w
        m_flat = (c1 * jnp.eye(C, dtype=jnp.float32) - c2 * self.w).reshape(-1)
        bias = (-c2 * (self.b + temb)).astype(jnp.float32)
        c3 = jnp.sqrt(jnp.maximum(self.posterior_variance[t], 0.0))
        c3 = jnp.reshape(c3, (1,)).astype(jnp.float32)

        # --- (B, C, rows, 128) layout: lane-dense AND sublane-dense ---
        x_flat = x.reshape(B, C, P).astype(jnp.float32)
        if P_pad != P:
            # TODO(synk): a real sampling loop should keep the image in the
            # padded layout across all t_max steps instead of pad/slice per call.
            x_flat = jnp.pad(x_flat, ((0, 0), (0, 0), (0, P_pad - P)))
        x_tiled = x_flat.reshape(B, C, rows_pad, 128)

        with_noise = t != 0
        blk = (1, C, R_TILE, 128)
        idx = lambda b, r: (b, 0, r, 0)
        smem = pl.BlockSpec(memory_space=pltpu.MemorySpace.SMEM)
        in_specs = [smem, smem, smem, pl.BlockSpec(blk, idx)]
        args = [m_flat, bias, c3, x_tiled]
        if with_noise:
            # TODO(synk): pltpu.prng_seed/stateful_normal would generate this
            # in-kernel (saving one HBM stream) but has no interpret-mode
            # lowering, so the Gaussian noise is streamed in from the host.
            noise = jax.random.normal(noise_key, (B, C, rows_pad, 128), jnp.float32)
            in_specs.append(pl.BlockSpec(blk, idx))
            args.append(noise)

        kernel = functools.partial(_generator_kernel, C=C, with_noise=with_noise)
        out = pl.pallas_call(
            kernel,
            out_shape=jax.ShapeDtypeStruct((B, C, rows_pad, 128), jnp.float32),
            grid=(B, rows_pad // R_TILE),
            in_specs=in_specs,
            out_specs=pl.BlockSpec(blk, idx),
            compiler_params=pltpu.CompilerParams(
                dimension_semantics=("parallel", "parallel"),
                vmem_limit_bytes=32 * 1024 * 1024,
            ),
        )(*args)

        out = out.reshape(B, C, P_pad)
        if P_pad != P:
            out = out[:, :, :P]
        return out.reshape(B, C, H, W)


if __name__ == "__main__":
    key = jax.random.PRNGKey(0)
    k_x, k_noise = jax.random.split(key)

    B, C, H, W = 2, 4, 16, 16
    x = jax.random.normal(k_x, (B, C, H, W), jnp.float32)
    gen = Generator(t_max=300, channels=C, seed=0)

    def reference(x_in, t, noise_key):
        c1 = gen.sqrt_recip_alphas[t]
        c2 = c1 * gen.betas[t] / gen.sqrt_one_minus_alphas_cumprod[t]
        bias_t = gen.b + jnp.sin(jnp.float32(t) * 0.1) * gen.time_w
        eps = jnp.einsum("bihw,io->bohw", x_in, gen.w) + bias_t.reshape(1, C, 1, 1)
        mean = c1 * x_in - c2 * eps
        if t == 0:
            return mean
        Bx, Cx, Hx, Wx = x_in.shape
        n_rows = (Hx * Wx) // 128  # exact for the shapes checked below
        noise = jax.random.normal(noise_key, (Bx, Cx, n_rows, 128), jnp.float32)
        noise = noise.reshape(Bx, Cx, Hx, Wx)
        return mean + jnp.sqrt(gen.posterior_variance[t]) * noise

    # t > 0: stochastic branch (host noise streamed through the kernel).
    out = jax.block_until_ready(gen(x, 5, k_noise))
    assert out.shape == (B, C, H, W)
    assert bool(jnp.allclose(out, reference(x, 5, k_noise), rtol=1e-4, atol=1e-5))

    # t == 0: deterministic branch (no noise input / math at all).
    out0 = jax.block_until_ready(gen(x, 0, k_noise))
    assert out0.shape == (B, C, H, W)
    assert bool(jnp.allclose(out0, reference(x, 0, k_noise), rtol=1e-4, atol=1e-5))

    # Non-multiple-of-128 spatial size: exercises the pixel-axis padding path.
    x_small = jax.random.normal(jax.random.PRNGKey(1), (1, C, 10, 10), jnp.float32)
    out_small = jax.block_until_ready(gen(x_small, 7, jax.random.PRNGKey(2)))
    assert out_small.shape == (1, C, 10, 10)
    assert bool(jnp.all(jnp.isfinite(out_small)))

    print("KERNEL_OK")
</pallas_src>

<mosaic_0001>
module attributes {stable_mosaic.version = 11 : i64} {
  func.func @_generator_kernel(%arg0: i32, %arg1: i32, %arg2: memref<16xf32, #tpu.memory_space<smem>>, %arg3: memref<4xf32, #tpu.memory_space<smem>>, %arg4: memref<1xf32, #tpu.memory_space<smem>>, %arg5: memref<1x4x2x128xf32, #tpu.memory_space<vmem>>, %arg6: memref<1x4x2x128xf32, #tpu.memory_space<vmem>>, %arg7: memref<1x4x2x128xf32, #tpu.memory_space<vmem>>) attributes {dimension_semantics = [#tpu.dimension_semantics<parallel>, #tpu.dimension_semantics<parallel>], iteration_bounds = array<i64: 2, 1>, scalar_prefetch = 0 : i64, scratch_operands = 0 : i64, tpu.core_type = #tpu.core_type<tc>, window_params = [{transform_indices = @transform_0, window_bounds = array<i64: 16>}, {transform_indices = @transform_1, window_bounds = array<i64: 4>}, {transform_indices = @transform_2, window_bounds = array<i64: 1>}, {transform_indices = @transform_3, window_bounds = array<i64: 1, 4, 2, 128>}, {transform_indices = @transform_4, window_bounds = array<i64: 1, 4, 2, 128>}, {transform_indices = @transform_5, window_bounds = array<i64: 1, 4, 2, 128>}]} {
    %c0 = arith.constant 0 : index
    %c0_0 = arith.constant 0 : index
    %c0_1 = arith.constant 0 : index
    %c0_2 = arith.constant 0 : index
    %0 = vector.load %arg5[%c0, %c0_0, %c0_1, %c0_2] : memref<1x4x2x128xf32, #tpu.memory_space<vmem>>, vector<1x1x2x128xf32>
    %1 = vector.shape_cast %0 : vector<1x1x2x128xf32> to vector<2x128xf32>
    %c0_3 = arith.constant 0 : index
    %c1 = arith.constant 1 : index
    %c0_4 = arith.constant 0 : index
    %c0_5 = arith.constant 0 : index
    %2 = vector.load %arg5[%c0_3, %c1, %c0_4, %c0_5] : memref<1x4x2x128xf32, #tpu.memory_space<vmem>>, vector<1x1x2x128xf32>
    %3 = vector.shape_cast %2 : vector<1x1x2x128xf32> to vector<2x128xf32>
    %c0_6 = arith.constant 0 : index
    %c2 = arith.constant 2 : index
    %c0_7 = arith.constant 0 : index
    %c0_8 = arith.constant 0 : index
    %4 = vector.load %arg5[%c0_6, %c2, %c0_7, %c0_8] : memref<1x4x2x128xf32, #tpu.memory_space<vmem>>, vector<1x1x2x128xf32>
    %5 = vector.shape_cast %4 : vector<1x1x2x128xf32> to vector<2x128xf32>
    %c0_9 = arith.constant 0 : index
    %c3 = arith.constant 3 : index
    %c0_10 = arith.constant 0 : index
    %c0_11 = arith.constant 0 : index
    %6 = vector.load %arg5[%c0_9, %c3, %c0_10, %c0_11] : memref<1x4x2x128xf32, #tpu.memory_space<vmem>>, vector<1x1x2x128xf32>
    %7 = vector.shape_cast %6 : vector<1x1x2x128xf32> to vector<2x128xf32>
    %c0_12 = arith.constant 0 : index
    %8 = memref.load %arg2[%c0_12] : memref<16xf32, #tpu.memory_space<smem>>
    %9 = vector.broadcast %8 : f32 to vector<2x128xf32>
    %10 = arith.mulf %1, %9 : vector<2x128xf32>
    %c4 = arith.constant 4 : index
    %11 = memref.load %arg2[%c4] : memref<16xf32, #tpu.memory_space<smem>>
    %12 = vector.broadcast %11 : f32 to vector<2x128xf32>
    %13 = arith.mulf %3, %12 : vector<2x128xf32>
    %14 = arith.addf %10, %13 : vector<2x128xf32>
    %c8 = arith.constant 8 : index
    %15 = memref.load %arg2[%c8] : memref<16xf32, #tpu.memory_space<smem>>
    %16 = vector.broadcast %15 : f32 to vector<2x128xf32>
    %17 = arith.mulf %5, %16 : vector<2x128xf32>
    %18 = arith.addf %14, %17 : vector<2x128xf32>
    %c12 = arith.constant 12 : index
    %19 = memref.load %arg2[%c12] : memref<16xf32, #tpu.memory_space<smem>>
    %20 = vector.broadcast %19 : f32 to vector<2x128xf32>
    %21 = arith.mulf %7, %20 : vector<2x128xf32>
    %22 = arith.addf %18, %21 : vector<2x128xf32>
    %c0_13 = arith.constant 0 : index
    %23 = memref.load %arg3[%c0_13] : memref<4xf32, #tpu.memory_space<smem>>
    %24 = vector.broadcast %23 : f32 to vector<2x128xf32>
    %25 = arith.addf %22, %24 : vector<2x128xf32>
    %c0_14 = arith.constant 0 : index
    %26 = memref.load %arg4[%c0_14] : memref<1xf32, #tpu.memory_space<smem>>
    %c0_15 = arith.constant 0 : index
    %c0_16 = arith.constant 0 : index
    %c0_17 = arith.constant 0 : index
    %c0_18 = arith.constant 0 : index
    %27 = vector.load %arg6[%c0_15, %c0_16, %c0_17, %c0_18] : memref<1x4x2x128xf32, #tpu.memory_space<vmem>>, vector<1x1x2x128xf32>
    %28 = vector.shape_cast %27 : vector<1x1x2x128xf32> to vector<2x128xf32>
    %29 = vector.broadcast %26 : f32 to vector<2x128xf32>
    %30 = arith.mulf %29, %28 : vector<2x128xf32>
    %31 = arith.addf %25, %30 : vector<2x128xf32>
    %c0_19 = arith.constant 0 : index
    %c0_20 = arith.constant 0 : index
    %c0_21 = arith.constant 0 : index
    %c0_22 = arith.constant 0 : index
    %32 = vector.load %arg7[%c0_19, %c0_20, %c0_21, %c0_22] : memref<1x4x2x128xf32, #tpu.memory_space<vmem>>, vector<1x1x2x128xf32>
    %33 = vector.shape_cast %32 : vector<1x1x2x128xf32> to vector<2x128xf32>
    %34 = vector.shape_cast %31 : vector<2x128xf32> to vector<1x1x2x128xf32>
    tpu.vector_store %arg7[%c0_19, %c0_20, %c0_21, %c0_22], %34 {strides = array<i32>} : memref<1x4x2x128xf32, #tpu.memory_space<vmem>>, vector<1x1x2x128xf32>,
    %c1_23 = arith.constant 1 : index
    %35 = memref.load %arg2[%c1_23] : memref<16xf32, #tpu.memory_space<smem>>
    %36 = vector.broadcast %35 : f32 to vector<2x128xf32>
    %37 = arith.mulf %1, %36 : vector<2x128xf32>
    %c5 = arith.constant 5 : index
    %38 = memref.load %arg2[%c5] : memref<16xf32, #tpu.memory_space<smem>>
    %39 = vector.broadcast %38 : f32 to vector<2x128xf32>
    %40 = arith.mulf %3, %39 : vector<2x128xf32>
    %41 = arith.addf %37, %40 : vector<2x128xf32>
    %c9 = arith.constant 9 : index
    %42 = memref.load %arg2[%c9] : memref<16xf32, #tpu.memory_space<smem>>
    %43 = vector.broadcast %42 : f32 to vector<2x128xf32>
    %44 = arith.mulf %5, %43 : vector<2x128xf32>
    %45 = arith.addf %41, %44 : vector<2x128xf32>
    %c13 = arith.constant 13 : index
    %46 = memref.load %arg2[%c13] : memref<16xf32, #tpu.memory_space<smem>>
    %47 = vector.broadcast %46 : f32 to vector<2x128xf32>
    %48 = arith.mulf %7, %47 : vector<2x128xf32>
    %49 = arith.addf %45, %48 : vector<2x128xf32>
    %c1_24 = arith.constant 1 : index
    %50 = memref.load %arg3[%c1_24] : memref<4xf32, #tpu.memory_space<smem>>
    %51 = vector.broadcast %50 : f32 to vector<2x128xf32>
    %52 = arith.addf %49, %51 : vector<2x128xf32>
    %c0_25 = arith.constant 0 : index
    %53 = memref.load %arg4[%c0_25] : memref<1xf32, #tpu.memory_space<smem>>
    %c0_26 = arith.constant 0 : index
    %c1_27 = arith.constant 1 : index
    %c0_28 = arith.constant 0 : index
    %c0_29 = arith.constant 0 : index
    %54 = vector.load %arg6[%c0_26, %c1_27, %c0_28, %c0_29] : memref<1x4x2x128xf32, #tpu.memory_space<vmem>>, vector<1x1x2x128xf32>
    %55 = vector.shape_cast %54 : vector<1x1x2x128xf32> to vector<2x128xf32>
    %56 = vector.broadcast %53 : f32 to vector<2x128xf32>
    %57 = arith.mulf %56, %55 : vector<2x128xf32>
    %58 = arith.addf %52, %57 : vector<2x128xf32>
    %c0_30 = arith.constant 0 : index
    %c1_31 = arith.constant 1 : index
    %c0_32 = arith.constant 0 : index
    %c0_33 = arith.constant 0 : index
    %59 = vector.load %arg7[%c0_30, %c1_31, %c0_32, %c0_33] : memref<1x4x2x128xf32, #tpu.memory_space<vmem>>, vector<1x1x2x128xf32>
    %60 = vector.shape_cast %59 : vector<1x1x2x128xf32> to vector<2x128xf32>
    %61 = vector.shape_cast %58 : vector<2x128xf32> to vector<1x1x2x128xf32>
    tpu.vector_store %arg7[%c0_30, %c1_31, %c0_32, %c0_33], %61 {strides = array<i32>} : memref<1x4x2x128xf32, #tpu.memory_space<vmem>>, vector<1x1x2x128xf32>,
    %c2_34 = arith.constant 2 : index
    %62 = memref.load %arg2[%c2_34] : memref<16xf32, #tpu.memory_space<smem>>
    %63 = vector.broadcast %62 : f32 to vector<2x128xf32>
    %64 = arith.mulf %1, %63 : vector<2x128xf32>
    %c6 = arith.constant 6 : index
    %65 = memref.load %arg2[%c6] : memref<16xf32, #tpu.memory_space<smem>>
    %66 = vector.broadcast %65 : f32 to vector<2x128xf32>
    %67 = arith.mulf %3, %66 : vector<2x128xf32>
    %68 = arith.addf %64, %67 : vector<2x128xf32>
    %c10 = arith.constant 10 : index
    %69 = memref.load %arg2[%c10] : memref<16xf32, #tpu.memory_space<smem>>
    %70 = vector.broadcast %69 : f32 to vector<2x128xf32>
    %71 = arith.mulf %5, %70 : vector<2x128xf32>
    %72 = arith.addf %68, %71 : vector<2x128xf32>
    %c14 = arith.constant 14 : index
    %73 = memref.load %arg2[%c14] : memref<16xf32, #tpu.memory_space<smem>>
    %74 = vector.broadcast %73 : f32 to vector<2x128xf32>
    %75 = arith.mulf %7, %74 : vector<2x128xf32>
    %76 = arith.addf %72, %75 : vector<2x128xf32>
    %c2_35 = arith.constant 2 : index
    %77 = memref.load %arg3[%c2_35] : memref<4xf32, #tpu.memory_space<smem>>
    %78 = vector.broadcast %77 : f32 to vector<2x128xf32>
    %79 = arith.addf %76, %78 : vector<2x128xf32>
    %c0_36 = arith.constant 0 : index
    %80 = memref.load %arg4[%c0_36] : memref<1xf32, #tpu.memory_space<smem>>
    %c0_37 = arith.constant 0 : index
    %c2_38 = arith.constant 2 : index
    %c0_39 = arith.constant 0 : index
    %c0_40 = arith.constant 0 : index
    %81 = vector.load %arg6[%c0_37, %c2_38, %c0_39, %c0_40] : memref<1x4x2x128xf32, #tpu.memory_space<vmem>>, vector<1x1x2x128xf32>
    %82 = vector.shape_cast %81 : vector<1x1x2x128xf32> to vector<2x128xf32>
    %83 = vector.broadcast %80 : f32 to vector<2x128xf32>
    %84 = arith.mulf %83, %82 : vector<2x128xf32>
    %85 = arith.addf %79, %84 : vector<2x128xf32>
    %c0_41 = arith.constant 0 : index
    %c2_42 = arith.constant 2 : index
    %c0_43 = arith.constant 0 : index
    %c0_44 = arith.constant 0 : index
    %86 = vector.load %arg7[%c0_41, %c2_42, %c0_43, %c0_44] : memref<1x4x2x128xf32, #tpu.memory_space<vmem>>, vector<1x1x2x128xf32>
    %87 = vector.shape_cast %86 : vector<1x1x2x128xf32> to vector<2x128xf32>
    %88 = vector.shape_cast %85 : vector<2x128xf32> to vector<1x1x2x128xf32>
    tpu.vector_store %arg7[%c0_41, %c2_42, %c0_43, %c0_44], %88 {strides = array<i32>} : memref<1x4x2x128xf32, #tpu.memory_space<vmem>>, vector<1x1x2x128xf32>,
    %c3_45 = arith.constant 3 : index
    %89 = memref.load %arg2[%c3_45] : memref<16xf32, #tpu.memory_space<smem>>
    %90 = vector.broadcast %89 : f32 to vector<2x128xf32>
    %91 = arith.mulf %1, %90 : vector<2x128xf32>
    %c7 = arith.constant 7 : index
    %92 = memref.load %arg2[%c7] : memref<16xf32, #tpu.memory_space<smem>>
    %93 = vector.broadcast %92 : f32 to vector<2x128xf32>
    %94 = arith.mulf %3, %93 : vector<2x128xf32>
    %95 = arith.addf %91, %94 : vector<2x128xf32>
    %c11 = arith.constant 11 : index
    %96 = memref.load %arg2[%c11] : memref<16xf32, #tpu.memory_space<smem>>
    %97 = vector.broadcast %96 : f32 to vector<2x128xf32>
    %98 = arith.mulf %5, %97 : vector<2x128xf32>
    %99 = arith.addf %95, %98 : vector<2x128xf32>
    %c15 = arith.constant 15 : index
    %100 = memref.load %arg2[%c15] : memref<16xf32, #tpu.memory_space<smem>>
    %101 = vector.broadcast %100 : f32 to vector<2x128xf32>
    %102 = arith.mulf %7, %101 : vector<2x128xf32>
    %103 = arith.addf %99, %102 : vector<2x128xf32>
    %c3_46 = arith.constant 3 : index
    %104 = memref.load %arg3[%c3_46] : memref<4xf32, #tpu.memory_space<smem>>
    %105 = vector.broadcast %104 : f32 to vector<2x128xf32>
    %106 = arith.addf %103, %105 : vector<2x128xf32>
    %c0_47 = arith.constant 0 : index
    %107 = memref.load %arg4[%c0_47] : memref<1xf32, #tpu.memory_space<smem>>
    %c0_48 = arith.constant 0 : index
    %c3_49 = arith.constant 3 : index
    %c0_50 = arith.constant 0 : index
    %c0_51 = arith.constant 0 : index
    %108 = vector.load %arg6[%c0_48, %c3_49, %c0_50, %c0_51] : memref<1x4x2x128xf32, #tpu.memory_space<vmem>>, vector<1x1x2x128xf32>
    %109 = vector.shape_cast %108 : vector<1x1x2x128xf32> to vector<2x128xf32>
    %110 = vector.broadcast %107 : f32 to vector<2x128xf32>
    %111 = arith.mulf %110, %109 : vector<2x128xf32>
    %112 = arith.addf %106, %111 : vector<2x128xf32>
    %c0_52 = arith.constant 0 : index
    %c3_53 = arith.constant 3 : index
    %c0_54 = arith.constant 0 : index
    %c0_55 = arith.constant 0 : index
    %113 = vector.load %arg7[%c0_52, %c3_53, %c0_54, %c0_55] : memref<1x4x2x128xf32, #tpu.memory_space<vmem>>, vector<1x1x2x128xf32>
    %114 = vector.shape_cast %113 : vector<1x1x2x128xf32> to vector<2x128xf32>
    %115 = vector.shape_cast %112 : vector<2x128xf32> to vector<1x1x2x128xf32>
    tpu.vector_store %arg7[%c0_52, %c3_53, %c0_54, %c0_55], %115 {strides = array<i32>} : memref<1x4x2x128xf32, #tpu.memory_space<vmem>>, vector<1x1x2x128xf32>,
    return
  }
  func.func @transform_0(%arg0: i32, %arg1: i32) -> i32 {
    %c0_i32 = arith.constant 0 : i32
    %c0_i32_0 = arith.constant 0 : i32
    return %c0_i32 : i32
  }
  func.func @transform_1(%arg0: i32, %arg1: i32) -> i32 {
    %c0_i32 = arith.constant 0 : i32
    %c0_i32_0 = arith.constant 0 : i32
    return %c0_i32 : i32
  }
  func.func @transform_2(%arg0: i32, %arg1: i32) -> i32 {
    %c0_i32 = arith.constant 0 : i32
    %c0_i32_0 = arith.constant 0 : i32
    return %c0_i32 : i32
  }
  func.func @transform_3(%arg0: i32, %arg1: i32) -> (i32, i32, i32, i32) {
    %c0_i32 = arith.constant 0 : i32
    %c0_i32_0 = arith.constant 0 : i32
    %c0_i32_1 = arith.constant 0 : i32
    return %arg0, %c0_i32, %arg1, %c0_i32_0 : i32, i32, i32, i32
  }
  func.func @transform_4(%arg0: i32, %arg1: i32) -> (i32, i32, i32, i32) {
    %c0_i32 = arith.constant 0 : i32
    %c0_i32_0 = arith.constant 0 : i32
    %c0_i32_1 = arith.constant 0 : i32
    return %arg0, %c0_i32, %arg1, %c0_i32_0 : i32, i32, i32, i32
  }
  func.func @transform_5(%arg0: i32, %arg1: i32) -> (i32, i32, i32, i32) {
    %c0_i32 = arith.constant 0 : i32
    %c0_i32_0 = arith.constant 0 : i32
    %c0_i32_1 = arith.constant 0 : i32
    return %arg0, %c0_i32, %arg1, %c0_i32_0 : i32, i32, i32, i32
  }
}

</mosaic_0001>

<bundles_post_ra>
// kernel: tpu_custom_call.1
= control target key start
LH: loop header
LB: loop body
LE: loop exit
PB: predicated region body
PF: predicated region fallthrough
CT: control target
= control target key end

     0   :  { %s1196_s0 = inlined_call_operand.vmem [shape: f32[16], index: 0, kind: input, shape index: {}]   ;;  %s1197_s1 = inlined_call_operand.vmem [shape: f32[4], index: 1, kind: input, shape index: {}]   ;;  %s1198_s2 = inlined_call_operand.<no memory space> [shape: f32[1], index: 2, kind: input, shape index: {}]   ;;  %s1199_s3 = inlined_call_operand.hbm [shape: f32[2,4,2,128], index: 3, kind: input, shape index: {}]   ;;  %s1200_s4 = inlined_call_operand.hbm [shape: f32[2,4,2,128], index: 4, kind: input, shape index: {}]   ;;  %s1201_s5 = inlined_call_operand.hbm [shape: f32[2,4,2,128], index: 5, kind: output, shape index: {}]  }
   0x1   :  { %1204 = sst [smem:[#allocation20_spill]] %s1196_s0 }
   0x2   :  { %1205 = sst [smem:[#allocation21_spill]] %s1197_s1 }
   0x3   :  { %1206 = sst [smem:[#allocation22_spill]] %s1199_s3 }
   0x4   :  { %10 = sst [smem:[#allocation2]] %s1198_s2 }
   0x5   :  { %11 = vsyncpa [#allocation6], 0 }
   0x6   :  { %12 = vsyncpa [#allocation8], 0 }
   0x7   :  { %13 = vsyncpa [#allocation4], 0 }
   0x8   :  { %15 = vsyncpa [#allocation4 + $0x1], 0 }
   0x9   :  { %16 = vsyncpa [#allocation11], 0 }
   0xa   :  { %18 = vsyncpa [#allocation11 + $0x1], 0 }
   0xb   :  { %19 = vsyncpa [#allocation5], 0 }
   0xc   :  { %21 = vsyncpa [#allocation5 + $0x1], 0  ;;  %s963_s20 = smov 0   ;;  %s965_s21 = smov 0  }
   0xd   :  { %s967_s22 = smov 0   ;;  %s969_s23 = smov 0  }
   0xe   :  { %s971_s24 = smov 0   ;;  %s973_s25 = smov 0  }
   0xf LB: > { %1207 = sst [smem:[#allocation18_spill]] %s918_s24  ;;  %s593_s2 = sadd.s32 4294967295, %s922_s25   ;;  %s922_s25 = sphi %s973_s25, %s27_s25   ;;  %s918_s24 = sphi %s971_s24, %s1220_s24   ;;  %s914_s23 = sphi %s969_s23, %s1219_s23   ;;  %s910_s22 = sphi %s967_s22, %s1223_s22   ;;  %s906_s21 = sphi %s965_s21, %s1222_s21   ;;  %s902_s20 = sphi %s963_s20, %s1221_s20  }
  0x10   : > { %s594_s26 = sadd.s32 4294967294, %s922_s25   ;;  %s111_s27 = sadd.s32 1, %s910_s22 }
  0x11   : > { %p118_p0 = scmp.ne.s32.totalorder %s910_s22, %s906_s21  ;;  %p119_p1 = scmp.eq.s32.totalorder %s922_s25, 0 }
  0x12   : > { %p124_p2 = scmp.ne.s32.totalorder %s906_s21, %s902_s20  ;;  %p1001_p3 = scmp.eq.s32.totalorder %s593_s2, 0 }
  0x13   : > { %p178_p4 = scmp.eq.s32.totalorder %s593_s2, 1  ;;  %p1005_p5 = por %p119_p1, %p118_p0 }
  0x14   : > { %p184_p6 = scmp.eq.s32.totalorder %s594_s26, 1  ;;  %p1011_p7 = por %p1001_p3, %p124_p2 }
  0x15   : > { %p1015_p8 = por %p178_p4, %p118_p0  ;;  %p595_p10 = scmp.ge.s32.totalorder %s922_s25, 1 }
  0x16   : > { %p1019_p9 = por %p184_p6, %p124_p2  ;;  %p191_p11 = scmp.lt.s32.totalorder %s922_s25, 3 }
  0x17   : > { %s1213_s0 = sld [smem:[#allocation20_spill]]  ;;  %p598_p13 = scmp.ge.s32.totalorder %s922_s25, 2 }
  0x18   : > { %p1028_p12 = pnand %p595_p10, %p191_p11  ;;  %p680_p0 = scmp.lt.s32.totalorder %s922_s25, 2 }
  0x19   : > { %s1215_s1 = sld [smem:[#allocation21_spill]]  ;;  %s924_s16 = smov [#allocation3]  }
  0x1a   : > { %p660_p1 = pneg %p1028_p12  ;;  %p1041_p2 = pnand %p680_p0, %p1005_p5 }
  0x1b   : > { %s925_s17 = smov [#allocation7]   ;;  %s39_s18 = sadd.s32 1, %s918_s24 }
  0x1c   : > { %p661_p4 = pnand %p660_p1, %p1001_p3  ;;  %s1049_s19 = sand.u32 1, %s910_s22  }
  0x1d   : > { %s203_s10 = sshll.u32 %s1213_s0, 4  ;;  %p41_p6 = scmp.ge.s32.totalorder %s39_s18, 2  ;;  %s204_s10 = int_to_ptr.vmem [resolvable:$true] %s203_s10 }
  0x1e   : > { %663 = dma.vmem_to_smem (!%p661_p4), %s204_s10, 16, %s924_s16, [#allocation6]  }
  0x1f   : > { %s213_s14 = sshll.u32 %s1215_s1, 4  ;;  %s599_s2 = sshll.u32 %s1049_s19, 3  ;;  %s214_s14 = int_to_ptr.vmem [resolvable:$true] %s213_s14 }
  0x20   : > { %666 = dma.vmem_to_smem (!%p661_p4), %s214_s14, 16, %s925_s17, [#allocation8]  }
  0x21   : > { %s643_s26 = sshll.u32 %s918_s24, 3  ;;  %s1225_s18 = smov (%p41_p6, %s39_s18), 0 }
  0x22   : > { %1217 = sst [smem:[#allocation19_spill]] %s1225_s18  ;;  %s106_s10 = ssub.s32 %s918_s24, %s1225_s18 }
  0x23   : > { %s1218_s3 = sld [smem:[#allocation22_spill]]  ;;  %p109_p5 = scmp.eq.s32.totalorder %s106_s10, 0 }
  0x24   : > { %s231_s13 = scalar_lea.vmem [#allocation9], %s599_s2  ;;  %s228_s17 = scalar_lea.sflag [#allocation4], %s1049_s19 }
  0x25   : > { %s240_s14 = sshll.u32 %s231_s13, 4  ;;  %s926_s0 = smov 32   ;;  %s241_s14 = int_to_ptr.vmem [resolvable:$true] %s240_s14 }
  0x26   : > { %s1063_s16 = scalar_select %p109_p5, %s910_s22, %s111_s27  }
  0x27   : > { %s927_s1 = smov 2   ;;  %s251_s24 = scalar_lea.sflag [#allocation11], %s1049_s19 }
  0x29   : > { %s237_s9 = scalar_lea.hbm %s1218_s3, %s643_s26  ;;  %s260_s3 = scalar_lea.hbm %s1200_s4, %s643_s26 }
  0x2a   : > { %s238_s12 = sshll.u32 %s237_s9, 4  ;;  %s254_s9 = scalar_lea.vmem [#allocation10], %s599_s2  ;;  %s239_s12 = int_to_ptr.hbm [resolvable:$true] %s238_s12 }
  0x2b   : > { %670 = dma.hbm_to_vmem [thread:$0]  (!%p1041_p2), %s239_s12, 128, %s241_s14, %s228_s17, %s926_s0, %s926_s0, %s927_s1  }
  0x2c   : > { %s263_s10 = sshll.u32 %s254_s9, 4  ;;  %s261_s18 = sshll.u32 %s260_s3, 4  ;;  %s264_s10 = int_to_ptr.vmem [resolvable:$true] %s263_s10  ;;  %s262_s18 = int_to_ptr.hbm [resolvable:$true] %s261_s18 }
  0x2d   : > { %673 = dma.hbm_to_vmem [thread:$0]  (!%p1041_p2), %s262_s18, 128, %s264_s10, %s251_s24, %s926_s0, %s926_s0, %s927_s1  }
  0x2e   : > { %275 = sbr.rel (%p1028_p12) target bundleno = 102 (0x66), region = 40 }
  0x33   : > { %881 = dma.done.wait (%p1001_p3), [#allocation6], 16  }
  0x34   : > { %883 = vsyncadd (%p1001_p3), [#allocation6], 4294967280 }
  0x35   : > { %885 = dma.done.wait (%p1001_p3), [#allocation8], 16  }
  0x36   : > { %887 = vsyncadd (%p1001_p3), [#allocation8], 4294967280  ;;  %s1085_s3 = sand.u32 1, %s906_s21  }
  0x37   : > { %s1088_s0 = sshll.u32 %s1085_s3, 3  ;;  %s288_s1 = scalar_lea.sflag [#allocation4], %s1085_s3 }
  0x38   : > { %s291_s24 = scalar_lea.vmem [#allocation9], %s1088_s0 }
  0x39   : > { %889 = dma.done.wait (%p1011_p7), %s288_s1, 128  }
  0x3a   : > { %891 = vsyncadd (%p1011_p7), %s288_s1, 4294967168  ;;  %s298_s27 = scalar_lea.sflag [#allocation11], %s1085_s3  ;;  %s1098_s28 = scalar_lea.vmem [#allocation10], %s1088_s0 }
  0x3b   : > { %893 = dma.done.wait (%p1011_p7), %s298_s27, 128  }
  0x3c   : > { %895 = vsyncadd (%p1011_p7), %s298_s27, 4294967168 }
  0x3d   : > { %307 = sfence }
  0x3e   : > { %s342_s11 = sld [smem:[#allocation3]]  ;;  %v1104_v0 = vld [vmem:[%s291_s24] sm:$0x3]  ;;  %v1108_v1 = vld [vmem:[%s291_s24 + $0x2] sm:$0x3] }
  0x3f   : > { %s614_s15 = sld [smem:[#allocation3 + $0x4]]  ;;  %v1110_v2 = vld [vmem:[%s291_s24 + $0x4] sm:$0x3]  ;;  %v1112_v4 = vld [vmem:[%s291_s24 + $0x6] sm:$0x3] }
  0x40   : > { %s615_s18 = sld [smem:[#allocation3 + $0x8]]  ;;  %v361_v13 = vld [vmem:[%s1098_s28] sm:$0x3]  ;;  %v622_v29 = vld [vmem:[%s1098_s28 + $0x2] sm:$0x3] }
  0x41   : > { %s616_s19 = sld [smem:[#allocation3 + $0xc]]  ;;  %v629_v45 = vld [vmem:[%s1098_s28 + $0x4] sm:$0x3]  ;;  %v636_v61 = vld [vmem:[%s1098_s28 + $0x6] sm:$0x3]  ;;  %s445_s28 = scalar_lea.sflag [#allocation5], %s1085_s3 }
  0x42   : > { %s1106_s2 = sld [smem:[#allocation7]] }
  0x43   : > { %s360_s26 = sld [smem:[#allocation2]] }
  0x44   : > { %v343_v3 = vstv %s342_s11  ;;  %s617_s12 = sld [smem:[#allocation3 + $0x1]] }
  0x45   : > { %v344_v5 = vmul.f32 %v343_v3, %v1104_v0  ;;  %v346_v6 = vstv %s614_s15  ;;  %s618_s30 = sld [smem:[#allocation3 + $0x5]] }
  0x46   : > { %v347_v7 = vmul.f32 %v1108_v1, %v346_v6  ;;  %v350_v8 = vstv %s615_s18  ;;  %s619_s13 = sld [smem:[#allocation3 + $0x9]]  ;;  %s1136_s18 = scalar_lea.vmem [#allocation12], %s1088_s0 }
  0x47   : > { %v351_v9 = vmul.f32 %v1110_v2, %v350_v8  ;;  %v354_v10 = vstv %s616_s19  ;;  %s620_s14 = sld [smem:[#allocation3 + $0xd]]  ;;  %s645_s0 = sshll.u32 %s914_s23, 3 }
  0x48   : > { %v348_v11 = vadd.f32 %v347_v7, %v344_v5  ;;  %v355_v12 = vmul.f32 %v1112_v4, %v354_v10  ;;  %s1118_s17 = sld [smem:[#allocation7 + $0x1]]  ;;  %v358_v17 = vstv %s1106_s2  ;;  %s458_s23 = sshll.u32 %s1136_s18, 4  ;;  %s459_s23 = int_to_ptr.vmem [resolvable:$true] %s458_s23 }
  0x49   : > { %v1121_v14 = vstv %s360_s26  ;;  %s624_s29 = sld [smem:[#allocation3 + $0x2]] }
  0x4a   : > { %v352_v15 = vadd.f32 %v351_v9, %v348_v11  ;;  %v367_v16 = vstv %s617_s12  ;;  %s625_s8 = sld [smem:[#allocation3 + $0x6]]  ;;  %v363_v21 = vmul.f32 %v1121_v14, %v361_v13  ;;  %v388_v39 = vmul.f32 %v622_v29, %v1121_v14  ;;  %s457_s12 = scalar_lea.hbm %s1201_s5, %s645_s0 }
  0x4b   : > { %v368_v18 = vmul.f32 %v367_v16, %v1104_v0  ;;  %v370_v19 = vstv %s618_s30  ;;  %s626_s9 = sld [smem:[#allocation3 + $0xa]]  ;;  %v414_v55 = vmul.f32 %v629_v45, %v1121_v14  ;;  %s460_s30 = sshll.u32 %s457_s12, 4  ;;  %s461_s30 = int_to_ptr.hbm [resolvable:$true] %s460_s30 }
  0x4c   : > { %v356_v20 = vadd.f32 %v355_v12, %v352_v15  ;;  %v371_v22 = vmul.f32 %v1108_v1, %v370_v19  ;;  %v374_v23 = vstv %s619_s13  ;;  %s627_s10 = sld [smem:[#allocation3 + $0xe]]  ;;  %s842_s13 = sshra.s32 %s461_s30, 4  ;;  %s843_s13 = int_to_ptr.hbm [resolvable:$true] %s842_s13 }
  0x4d   : > { %v375_v24 = vmul.f32 %v1110_v2, %v374_v23  ;;  %v378_v25 = vstv %s620_s14  ;;  %s1128_s1 = sld [smem:[#allocation7 + $0x2]]  ;;  %s844_s14 = scalar_lea.hbm %s843_s13, 8 }
  0x4e   : > { %v359_v26 = vadd.f32 %v358_v17, %v356_v20  ;;  %v372_v27 = vadd.f32 %v371_v22, %v368_v18  ;;  %v379_v28 = vmul.f32 %v1112_v4, %v378_v25  ;;  %s631_s24 = sld [smem:[#allocation3 + $0x3]]  ;;  %v382_v35 = vstv %s1118_s17  ;;  %p845_p3 = scmp.ne.s32.totalorder %s843_s13, %s844_s14 }
  0x4f   : > { %v393_v30 = vstv %s624_s29  ;;  %s632_s27 = sld [smem:[#allocation3 + $0x7]]  ;;  %p849_p11 = scmp.lt.s32.totalorder %s843_s13, %s1201_s5 }
  0x50   : > { %v364_v31 = vadd.f32 %v363_v21, %v359_v26  ;;  %v376_v32 = vadd.f32 %v375_v24, %v372_v27  ;;  %v394_v33 = vmul.f32 %v393_v30, %v1104_v0  ;;  %v396_v34 = vstv %s625_s8  ;;  %s633_s11 = sld [smem:[#allocation3 + $0xb]]  ;;  %p846_p7 = pnand %p845_p3, %p1015_p8 }
  0x51   : > { %v397_v36 = vmul.f32 %v1108_v1, %v396_v34  ;;  %v400_v37 = vstv %s626_s9  ;;  %s634_s15 = sld [smem:[#allocation3 + $0xf]]  ;;  %s848_s8 = scalar_lea.hbm %s1201_s5, 16 }
  0x52   : > { %365 = vst [vmem:[%s1136_s18] sm:$0x3] %v364_v31  ;;  %v380_v38 = vadd.f32 %v379_v28, %v376_v32  ;;  %v401_v40 = vmul.f32 %v1110_v2, %v400_v37  ;;  %v404_v41 = vstv %s627_s10  ;;  %s1142_s19 = sld [smem:[#allocation7 + $0x3]]  ;;  %p847_p10 = pneg %p846_p7 }
  0x53   : > { %v398_v42 = vadd.f32 %v397_v36, %v394_v33  ;;  %v405_v43 = vmul.f32 %v1112_v4, %v404_v41  ;;  %v408_v51 = vstv %s1128_s1  ;;  %p850_p12 = scmp.lt.s32.totalorder %s848_s8, %s844_s14 }
  0x54   : > { %v383_v44 = vadd.f32 %v382_v35, %v380_v38  ;;  %v419_v46 = vstv %s631_s24 }
  0x55   : > { %v402_v47 = vadd.f32 %v401_v40, %v398_v42  ;;  %v420_v48 = vmul.f32 %v419_v46, %v1104_v0  ;;  %v422_v49 = vstv %s632_s27  ;;  %p851_p0 = por %p850_p12, %p849_p11 }
  0x56   : > { %v389_v50 = vadd.f32 %v388_v39, %v383_v44  ;;  %v423_v52 = vmul.f32 %v1108_v1, %v422_v49  ;;  %v426_v53 = vstv %s633_s11 }
  0x57   : > { %v406_v54 = vadd.f32 %v405_v43, %v402_v47  ;;  %v427_v56 = vmul.f32 %v1110_v2, %v426_v53  ;;  %v430_v57 = vstv %s634_s15  ;;  %v440_v2 = vmul.f32 %v636_v61, %v1121_v14  ;;  %p852_p1 = pnand %p851_p0, %p847_p10 }
  0x58   : > { %623 = vst [vmem:[%s1136_s18 + $0x2] sm:$0x3] %v389_v50  ;;  %v424_v58 = vadd.f32 %v423_v52, %v420_v48  ;;  %v431_v59 = vmul.f32 %v1112_v4, %v430_v57  ;;  %v434_v0 = vstv %s1142_s19 }
  0x59   : > { %v409_v60 = vadd.f32 %v408_v51, %v406_v54 }
  0x5a   : > { %v428_v62 = vadd.f32 %v427_v56, %v424_v58 }
  0x5b   : > { %v415_v63 = vadd.f32 %v414_v55, %v409_v60 }
  0x5c   : > { %v432_v1 = vadd.f32 %v431_v59, %v428_v62 }
  0x5d   : > { %630 = vst [vmem:[%s1136_s18 + $0x4] sm:$0x3] %v415_v63 }
  0x5e   : > { %v435_v3 = vadd.f32 %v434_v0, %v432_v1 }
  0x60   : > { %v441_v4 = vadd.f32 %v440_v2, %v435_v3 }
  0x62   : > { %637 = vst [vmem:[%s1136_s18 + $0x6] sm:$0x3] %v441_v4 }
  0x63   : > { %855 = shalt.err (!%p852_p1)
}
  0x64   : > { %s928_s3 = smov 32   ;;  %s929_s1 = smov 2  }
  0x65   : > { %658 = dma.vmem_to_hbm [thread:$0]  (%p1015_p8), %s459_s23, 128, %s461_s30, %s445_s28, %s928_s3, %s928_s3, %s929_s1  }
  0x66 PF: > { %s475_s24 = sand.u32 1, %s902_s20   ;;  %p675_p2 = pnand %p598_p13, %p1019_p9 }
  0x67   : > { %s476_s27 = scalar_lea.sflag [#allocation5], %s475_s24 }
  0x68   : > { %p676_p4 = pneg %p675_p2 }
  0x6a   : > { %897 = dma.done.wait (%p676_p4), %s476_s27, 128  }
  0x6b   : > { %899 = vsyncadd (%p676_p4), %s476_s27, 4294967168  ;;  %s27_s25 = sadd.s32 1, %s922_s25   ;;  %s1219_s23 = sld [smem:[#allocation18_spill]] }
  0x6c   : > { %p24_p6 = scmp.ge.s32.totalorder %s27_s25, 4   ;;  %s1220_s24 = sld [smem:[#allocation19_spill]] }
  0x6d   : > { %s1221_s20 = smov %s906_s21  ;;  %s1222_s21 = smov %s910_s22 }
  0x6e   : > { %s1223_s22 = smov %s1063_s16  ;;  %26 = sbr.rel (!%p24_p6) target bundleno = 15 (0xf), region = 116 }
  0x73   :  { %482 = vsyncpa [#allocation4], 1 }
  0x74   :  { %484 = vsyncpa [#allocation4 + $0x1], 1 }
  0x75   :  { %485 = vsyncpa [#allocation11], 1 }
  0x76   :  { %487 = vsyncpa [#allocation11 + $0x1], 1 }
  0x77   :  { %488 = vsyncpa [#allocation5], 1 }
  0x78   :  { %490 = vsyncpa [#allocation5 + $0x1], 1 }
  0x79   :  { %491 = vsyncpa [#allocation6], 1 }
  0x7a   :  { %493 = vsyncpa [#allocation6 + $0x1], 1 }
  0x7b   :  { %494 = vsyncpa [#allocation8], 1 }

</bundles_post_ra>
